<compile_context>
chip_gen: v7x
topology: tpu7x:2x2x1
jax: 0.10.0
libtpu: 0.0.40
codegen_flags: <defaults>
</compile_context>

<pallas_src>
import functools

import jax
import jax.numpy as jnp
from jax import lax
from jax.experimental import pallas as pl
from jax.experimental.pallas import tpu as pltpu


def _round_up(x, m):
    return ((x + m - 1) // m) * m


def _residual_block_kernel(x_ref, mask_ref, w1_ref, b1_ref, w2_ref, b2_ref,
                           out_ref, mid_ref, *, Rp, C, Wp, G, compute_dtype):
    """One batch element per grid step.

    x_ref    : (C, T)    zero-padded, flattened input plane (T = Rp + 2*G),
                         channels on sublanes, flattened (h, w) on lanes.
    mask_ref : (1, Rp)   1.0 on the true HxW interior, 0.0 on the padding ring
    w1_ref   : (9, C, C) conv1 per-tap weights (Co, Ci), BN1 scale folded in
    b1_ref   : (C, 1)    folded BN1 bias
    w2_ref   : (9, C, C) conv2 per-tap weights, BN2 scale folded in
    b2_ref   : (C, 1)    folded BN2 bias
    out_ref  : (C, Rp)   output over the padded plane (wrapper crops)
    mid_ref  : (C, T)    VMEM scratch staging the conv1 output (compute_dtype)
    """
    f32 = jnp.float32
    # Flat lane offset of tap (dh, dw) relative to the output position.
    offsets = [(dh - 1) * Wp + (dw - 1) for dh in range(3) for dw in range(3)]

    # Zero the guard lanes of the staging scratch EVERY step (cheap: 2*(C, G)
    # aligned stores).  The old program_id==0-gated init was fragile under a
    # two-TensorCore "parallel" split of the batch grid.
    zero_guard = jnp.zeros((C, G), compute_dtype)
    mid_ref[:, 0:G] = zero_guard
    mid_ref[:, G + Rp:G + Rp + G] = zero_guard

    def conv3x3(src_ref, w_ref, b_ref):
        # 9 accumulated K=C matmuls on lane-shifted views of the padded plane
        # (no im2col scratch).  Output has spatial Rp on the lane axis.
        acc = jnp.zeros((C, Rp), f32)
        for t, o in enumerate(offsets):
            acc = acc + jnp.dot(w_ref[t], src_ref[:, G + o:G + o + Rp],
                                preferred_element_type=f32)
        return acc + b_ref[...]          # BN scale already folded into w

    # conv1 -> BN1 -> ReLU, zero the conv-padding ring, stage (aligned,
    # lane-dense store in compute_dtype).
    h1 = jnp.maximum(conv3x3(x_ref, w1_ref, b1_ref), 0.0) * mask_ref[...]
    mid_ref[:, G:G + Rp] = h1.astype(compute_dtype)

    # conv2 -> BN2 -> +identity -> ReLU.  Identity is a contiguous aligned
    # lane slice of the input plane; output store is lane-dense.
    h2 = conv3x3(mid_ref, w2_ref, b2_ref)
    out_ref[...] = jnp.maximum(h2 + x_ref[:, G:G + Rp].astype(f32), 0.0)


def residual_block_pallas(x_nchw, w1_hwio, w2_hwio,
                          gamma1, beta1, mean1, var1,
                          gamma2, beta2, mean2, var2,
                          eps=1e-5, compute_dtype=jnp.bfloat16):
    """Forward pass of ResidualBlock.  x_nchw: (N, C, H, W) float32."""
    N, C, H, W = x_nchw.shape
    f32 = jnp.float32

    Wp = W + 2                       # padded width (conv zero-padding ring)
    Hp = H + 2                       # padded height
    R = Hp * Wp                      # flattened padded plane
    Rp = _round_up(R, 128)           # lane-dense (128-aligned) plane width
    G = _round_up(Wp + 1, 128)       # guard lanes covering all 9 tap offsets
    T = Rp + 2 * G

    # ---- glue: padding, flattening, BN folding, dtype casts (plain JAX) ----
    x_pad = jnp.pad(x_nchw.astype(f32), ((0, 0), (0, 0), (1, 1), (1, 1)))
    x_flat = x_pad.reshape(N, C, R)                                   # (N,C,R)
    x_ext = jnp.pad(x_flat, ((0, 0), (0, 0), (G, G + Rp - R)))        # (N,C,T)
    x_ext = x_ext.astype(compute_dtype)

    rows = jnp.arange(Hp)[:, None]
    cols = jnp.arange(Wp)[None, :]
    interior = (rows >= 1) & (rows <= H) & (cols >= 1) & (cols <= W)
    mask = jnp.pad(interior.astype(f32).reshape(1, R),
                   ((0, 0), (0, Rp - R)))                             # (1,Rp)

    # Fold eval-mode BN scale into the conv weights; per-tap (Co, Ci) layout
    # so the matmul output puts the spatial axis on the 128 lanes.
    s1 = gamma1 / jnp.sqrt(var1 + eps)
    s2 = gamma2 / jnp.sqrt(var2 + eps)
    w1 = jnp.transpose((w1_hwio * s1).reshape(9, C, C),
                       (0, 2, 1)).astype(compute_dtype)               # (9,Co,Ci)
    w2 = jnp.transpose((w2_hwio * s2).reshape(9, C, C),
                       (0, 2, 1)).astype(compute_dtype)
    b1 = (beta1 - mean1 * s1).reshape(C, 1).astype(f32)
    b2 = (beta2 - mean2 * s2).reshape(C, 1).astype(f32)

    kernel = functools.partial(_residual_block_kernel, Rp=Rp, C=C, Wp=Wp, G=G,
                               compute_dtype=compute_dtype)

    out_flat = pl.pallas_call(
        kernel,
        out_shape=jax.ShapeDtypeStruct((N, C, Rp), f32),
        grid_spec=pltpu.PrefetchScalarGridSpec(
            num_scalar_prefetch=0,
            grid=(N,),
            in_specs=[
                pl.BlockSpec((None, C, T), lambda n: (n, 0, 0)),
                pl.BlockSpec((1, Rp), lambda n: (0, 0)),
                pl.BlockSpec((9, C, C), lambda n: (0, 0, 0)),
                pl.BlockSpec((C, 1), lambda n: (0, 0)),
                pl.BlockSpec((9, C, C), lambda n: (0, 0, 0)),
                pl.BlockSpec((C, 1), lambda n: (0, 0)),
            ],
            out_specs=pl.BlockSpec((None, C, Rp), lambda n: (n, 0, 0)),
            scratch_shapes=[
                pltpu.VMEM((C, T), compute_dtype),   # staged conv1 output
            ],
        ),
        compiler_params=pltpu.CompilerParams(
            dimension_semantics=("parallel",),
            vmem_limit_bytes=32 * 1024 * 1024),
    )(x_ext, mask, w1, b1, w2, b2)

    # Crop the valid HxW interior (NCHW layout needs no transpose here).
    out = out_flat[:, :, :R].reshape(N, C, Hp, Wp)[:, :, 1:H + 1, 1:W + 1]
    return out


def _reference(x_nchw, w1_hwio, w2_hwio,
               gamma1, beta1, mean1, var1,
               gamma2, beta2, mean2, var2, eps=1e-5):
    """Pure-JAX reference of the same forward pass (eval-mode BN)."""
    x = jnp.transpose(x_nchw, (0, 2, 3, 1))
    dn = ("NHWC", "HWIO", "NHWC")

    def bn(x, g, b, m, v):
        return (x - m) / jnp.sqrt(v + eps) * g + b

    out = lax.conv_general_dilated(x, w1_hwio, (1, 1), "SAME",
                                   dimension_numbers=dn)
    out = jax.nn.relu(bn(out, gamma1, beta1, mean1, var1))
    out = lax.conv_general_dilated(out, w2_hwio, (1, 1), "SAME",
                                   dimension_numbers=dn)
    out = bn(out, gamma2, beta2, mean2, var2)
    out = jax.nn.relu(out + x)
    return jnp.transpose(out, (0, 3, 1, 2))


if __name__ == "__main__":
    N, C, H, W = 2, 4, 16, 16

    key = jax.random.PRNGKey(0)
    keys = jax.random.split(key, 8)

    x = jax.random.normal(keys[0], (N, C, H, W), jnp.float32)

    # Conv weights stored HWIO (kh, kw, Ci, Co); deterministic synthetic init.
    w1 = jax.random.normal(keys[1], (3, 3, C, C), jnp.float32) * 0.2
    w2 = jax.random.normal(keys[2], (3, 3, C, C), jnp.float32) * 0.2

    # BatchNorm params / running stats (deterministic synthetic init).
    gamma1 = 1.0 + 0.1 * jax.random.normal(keys[3], (C,), jnp.float32)
    beta1 = 0.1 * jax.random.normal(keys[4], (C,), jnp.float32)
    mean1 = 0.05 * jax.random.normal(keys[5], (C,), jnp.float32)
    var1 = jnp.abs(1.0 + 0.1 * jax.random.normal(keys[6], (C,), jnp.float32))
    gamma2 = jnp.ones((C,), jnp.float32)
    beta2 = jnp.zeros((C,), jnp.float32)
    mean2 = jnp.zeros((C,), jnp.float32)
    var2 = jnp.ones((C,), jnp.float32)

    ref = _reference(x, w1, w2, gamma1, beta1, mean1, var1,
                     gamma2, beta2, mean2, var2)

    # f32 matmul path: tight tolerance.
    out_f32 = jax.block_until_ready(residual_block_pallas(
        x, w1, w2, gamma1, beta1, mean1, var1, gamma2, beta2, mean2, var2,
        compute_dtype=jnp.float32))
    assert out_f32.shape == (N, C, H, W)
    assert jnp.allclose(out_f32, ref, atol=1e-4, rtol=1e-4), "f32 mismatch"

    # bf16 MXU operands + bf16 staged intermediate (f32 accumulation):
    # looser tolerance (two chained convs with bf16-rounded operands).
    out_bf16 = jax.block_until_ready(residual_block_pallas(
        x, w1, w2, gamma1, beta1, mean1, var1, gamma2, beta2, mean2, var2,
        compute_dtype=jnp.bfloat16))
    assert out_bf16.shape == (N, C, H, W)
    assert jnp.allclose(out_bf16, ref, atol=1e-1, rtol=1e-1), "bf16 mismatch"

    print("KERNEL_OK")
</pallas_src>

<mosaic_0001>
module attributes {stable_mosaic.version = 11 : i64} {
  func.func @_residual_block_kernel(%arg0: i32, %arg1: memref<1x4x640xf32, #tpu.memory_space<vmem>>, %arg2: memref<1x384xf32, #tpu.memory_space<vmem>>, %arg3: memref<9x4x4xf32, #tpu.memory_space<vmem>>, %arg4: memref<4x1xf32, #tpu.memory_space<vmem>>, %arg5: memref<9x4x4xf32, #tpu.memory_space<vmem>>, %arg6: memref<4x1xf32, #tpu.memory_space<vmem>>, %arg7: memref<1x4x384xf32, #tpu.memory_space<vmem>>, %arg8: memref<4x640xf32, #tpu.memory_space<vmem>>) attributes {dimension_semantics = [#tpu.dimension_semantics<parallel>], iteration_bounds = array<i64: 2>, scalar_prefetch = 0 : i64, scratch_operands = 1 : i64, tpu.core_type = #tpu.core_type<tc>, window_params = [{transform_indices = @transform_0, window_bounds = array<i64: 1, 4, 640>}, {pipeline_mode = #tpu.pipeline_mode<synchronous>, transform_indices = @transform_1, window_bounds = array<i64: 1, 384>}, {pipeline_mode = #tpu.pipeline_mode<synchronous>, transform_indices = @transform_2, window_bounds = array<i64: 9, 4, 4>}, {pipeline_mode = #tpu.pipeline_mode<synchronous>, transform_indices = @transform_3, window_bounds = array<i64: 4, 1>}, {pipeline_mode = #tpu.pipeline_mode<synchronous>, transform_indices = @transform_4, window_bounds = array<i64: 9, 4, 4>}, {pipeline_mode = #tpu.pipeline_mode<synchronous>, transform_indices = @transform_5, window_bounds = array<i64: 4, 1>}, {transform_indices = @transform_6, window_bounds = array<i64: 1, 4, 384>}]} {
    %cst = arith.constant 0.000000e+00 : f32
    %0 = vector.broadcast %cst : f32 to vector<4x128xf32>
    %c0 = arith.constant 0 : index
    %c0_0 = arith.constant 0 : index
    %1 = vector.load %arg8[%c0, %c0_0] : memref<4x640xf32, #tpu.memory_space<vmem>>, vector<4x128xf32>
    tpu.vector_store %arg8[%c0, %c0_0], %0 {strides = array<i32>} : memref<4x640xf32, #tpu.memory_space<vmem>>, vector<4x128xf32>,
    %c0_1 = arith.constant 0 : index
    %c512 = arith.constant 512 : index
    %2 = vector.load %arg8[%c0_1, %c512] : memref<4x640xf32, #tpu.memory_space<vmem>>, vector<4x128xf32>
    tpu.vector_store %arg8[%c0_1, %c512], %0 {strides = array<i32>} : memref<4x640xf32, #tpu.memory_space<vmem>>, vector<4x128xf32>,
    %cst_2 = arith.constant 0.000000e+00 : f32
    %3 = vector.broadcast %cst_2 : f32 to vector<4x384xf32>
    %c0_3 = arith.constant 0 : index
    %c0_4 = arith.constant 0 : index
    %c0_5 = arith.constant 0 : index
    %4 = vector.load %arg3[%c0_3, %c0_4, %c0_5] : memref<9x4x4xf32, #tpu.memory_space<vmem>>, vector<1x4x4xf32>
    %5 = vector.shape_cast %4 : vector<1x4x4xf32> to vector<4x4xf32>
    %c0_6 = arith.constant 0 : index
    %c0_7 = arith.constant 0 : index
    %c109 = arith.constant 109 : index
    %6 = vector.load %arg1[%c0_6, %c0_7, %c109] : memref<1x4x640xf32, #tpu.memory_space<vmem>>, vector<1x4x384xf32>
    %7 = vector.shape_cast %6 : vector<1x4x384xf32> to vector<4x384xf32>
    %cst_8 = arith.constant dense<0.000000e+00> : vector<4x384xf32>
    %8 = tpu.matmul %5, %7, %cst_8 {dimension_numbers = #tpu.dot_dimension_numbers<[1], [0], [0], [1], [0, 0, 1, 1], [], []>} : vector<4x4xf32>, vector<4x384xf32>, vector<4x384xf32> -> vector<4x384xf32>
    %9 = arith.addf %3, %8 : vector<4x384xf32>
    %c1 = arith.constant 1 : index
    %c0_9 = arith.constant 0 : index
    %c0_10 = arith.constant 0 : index
    %10 = vector.load %arg3[%c1, %c0_9, %c0_10] : memref<9x4x4xf32, #tpu.memory_space<vmem>>, vector<1x4x4xf32>
    %11 = vector.shape_cast %10 : vector<1x4x4xf32> to vector<4x4xf32>
    %c0_11 = arith.constant 0 : index
    %c0_12 = arith.constant 0 : index
    %c110 = arith.constant 110 : index
    %12 = vector.load %arg1[%c0_11, %c0_12, %c110] : memref<1x4x640xf32, #tpu.memory_space<vmem>>, vector<1x4x384xf32>
    %13 = vector.shape_cast %12 : vector<1x4x384xf32> to vector<4x384xf32>
    %cst_13 = arith.constant dense<0.000000e+00> : vector<4x384xf32>
    %14 = tpu.matmul %11, %13, %cst_13 {dimension_numbers = #tpu.dot_dimension_numbers<[1], [0], [0], [1], [0, 0, 1, 1], [], []>} : vector<4x4xf32>, vector<4x384xf32>, vector<4x384xf32> -> vector<4x384xf32>
    %15 = arith.addf %9, %14 : vector<4x384xf32>
    %c2 = arith.constant 2 : index
    %c0_14 = arith.constant 0 : index
    %c0_15 = arith.constant 0 : index
    %16 = vector.load %arg3[%c2, %c0_14, %c0_15] : memref<9x4x4xf32, #tpu.memory_space<vmem>>, vector<1x4x4xf32>
    %17 = vector.shape_cast %16 : vector<1x4x4xf32> to vector<4x4xf32>
    %c0_16 = arith.constant 0 : index
    %c0_17 = arith.constant 0 : index
    %c111 = arith.constant 111 : index
    %18 = vector.load %arg1[%c0_16, %c0_17, %c111] : memref<1x4x640xf32, #tpu.memory_space<vmem>>, vector<1x4x384xf32>
    %19 = vector.shape_cast %18 : vector<1x4x384xf32> to vector<4x384xf32>
    %cst_18 = arith.constant dense<0.000000e+00> : vector<4x384xf32>
    %20 = tpu.matmul %17, %19, %cst_18 {dimension_numbers = #tpu.dot_dimension_numbers<[1], [0], [0], [1], [0, 0, 1, 1], [], []>} : vector<4x4xf32>, vector<4x384xf32>, vector<4x384xf32> -> vector<4x384xf32>
    %21 = arith.addf %15, %20 : vector<4x384xf32>
    %c3 = arith.constant 3 : index
    %c0_19 = arith.constant 0 : index
    %c0_20 = arith.constant 0 : index
    %22 = vector.load %arg3[%c3, %c0_19, %c0_20] : memref<9x4x4xf32, #tpu.memory_space<vmem>>, vector<1x4x4xf32>
    %23 = vector.shape_cast %22 : vector<1x4x4xf32> to vector<4x4xf32>
    %c0_21 = arith.constant 0 : index
    %c0_22 = arith.constant 0 : index
    %c127 = arith.constant 127 : index
    %24 = vector.load %arg1[%c0_21, %c0_22, %c127] : memref<1x4x640xf32, #tpu.memory_space<vmem>>, vector<1x4x384xf32>
    %25 = vector.shape_cast %24 : vector<1x4x384xf32> to vector<4x384xf32>
    %cst_23 = arith.constant dense<0.000000e+00> : vector<4x384xf32>
    %26 = tpu.matmul %23, %25, %cst_23 {dimension_numbers = #tpu.dot_dimension_numbers<[1], [0], [0], [1], [0, 0, 1, 1], [], []>} : vector<4x4xf32>, vector<4x384xf32>, vector<4x384xf32> -> vector<4x384xf32>
    %27 = arith.addf %21, %26 : vector<4x384xf32>
    %c4 = arith.constant 4 : index
    %c0_24 = arith.constant 0 : index
    %c0_25 = arith.constant 0 : index
    %28 = vector.load %arg3[%c4, %c0_24, %c0_25] : memref<9x4x4xf32, #tpu.memory_space<vmem>>, vector<1x4x4xf32>
    %29 = vector.shape_cast %28 : vector<1x4x4xf32> to vector<4x4xf32>
    %c0_26 = arith.constant 0 : index
    %c0_27 = arith.constant 0 : index
    %c128 = arith.constant 128 : index
    %30 = vector.load %arg1[%c0_26, %c0_27, %c128] : memref<1x4x640xf32, #tpu.memory_space<vmem>>, vector<1x4x384xf32>
    %31 = vector.shape_cast %30 : vector<1x4x384xf32> to vector<4x384xf32>
    %cst_28 = arith.constant dense<0.000000e+00> : vector<4x384xf32>
    %32 = tpu.matmul %29, %31, %cst_28 {dimension_numbers = #tpu.dot_dimension_numbers<[1], [0], [0], [1], [0, 0, 1, 1], [], []>} : vector<4x4xf32>, vector<4x384xf32>, vector<4x384xf32> -> vector<4x384xf32>
    %33 = arith.addf %27, %32 : vector<4x384xf32>
    %c5 = arith.constant 5 : index
    %c0_29 = arith.constant 0 : index
    %c0_30 = arith.constant 0 : index
    %34 = vector.load %arg3[%c5, %c0_29, %c0_30] : memref<9x4x4xf32, #tpu.memory_space<vmem>>, vector<1x4x4xf32>
    %35 = vector.shape_cast %34 : vector<1x4x4xf32> to vector<4x4xf32>
    %c0_31 = arith.constant 0 : index
    %c0_32 = arith.constant 0 : index
    %c129 = arith.constant 129 : index
    %36 = vector.load %arg1[%c0_31, %c0_32, %c129] : memref<1x4x640xf32, #tpu.memory_space<vmem>>, vector<1x4x384xf32>
    %37 = vector.shape_cast %36 : vector<1x4x384xf32> to vector<4x384xf32>
    %cst_33 = arith.constant dense<0.000000e+00> : vector<4x384xf32>
    %38 = tpu.matmul %35, %37, %cst_33 {dimension_numbers = #tpu.dot_dimension_numbers<[1], [0], [0], [1], [0, 0, 1, 1], [], []>} : vector<4x4xf32>, vector<4x384xf32>, vector<4x384xf32> -> vector<4x384xf32>
    %39 = arith.addf %33, %38 : vector<4x384xf32>
    %c6 = arith.constant 6 : index
    %c0_34 = arith.constant 0 : index
    %c0_35 = arith.constant 0 : index
    %40 = vector.load %arg3[%c6, %c0_34, %c0_35] : memref<9x4x4xf32, #tpu.memory_space<vmem>>, vector<1x4x4xf32>
    %41 = vector.shape_cast %40 : vector<1x4x4xf32> to vector<4x4xf32>
    %c0_36 = arith.constant 0 : index
    %c0_37 = arith.constant 0 : index
    %c145 = arith.constant 145 : index
    %42 = vector.load %arg1[%c0_36, %c0_37, %c145] : memref<1x4x640xf32, #tpu.memory_space<vmem>>, vector<1x4x384xf32>
    %43 = vector.shape_cast %42 : vector<1x4x384xf32> to vector<4x384xf32>
    %cst_38 = arith.constant dense<0.000000e+00> : vector<4x384xf32>
    %44 = tpu.matmul %41, %43, %cst_38 {dimension_numbers = #tpu.dot_dimension_numbers<[1], [0], [0], [1], [0, 0, 1, 1], [], []>} : vector<4x4xf32>, vector<4x384xf32>, vector<4x384xf32> -> vector<4x384xf32>
    %45 = arith.addf %39, %44 : vector<4x384xf32>
    %c7 = arith.constant 7 : index
    %c0_39 = arith.constant 0 : index
    %c0_40 = arith.constant 0 : index
    %46 = vector.load %arg3[%c7, %c0_39, %c0_40] : memref<9x4x4xf32, #tpu.memory_space<vmem>>, vector<1x4x4xf32>
    %47 = vector.shape_cast %46 : vector<1x4x4xf32> to vector<4x4xf32>
    %c0_41 = arith.constant 0 : index
    %c0_42 = arith.constant 0 : index
    %c146 = arith.constant 146 : index
    %48 = vector.load %arg1[%c0_41, %c0_42, %c146] : memref<1x4x640xf32, #tpu.memory_space<vmem>>, vector<1x4x384xf32>
    %49 = vector.shape_cast %48 : vector<1x4x384xf32> to vector<4x384xf32>
    %cst_43 = arith.constant dense<0.000000e+00> : vector<4x384xf32>
    %50 = tpu.matmul %47, %49, %cst_43 {dimension_numbers = #tpu.dot_dimension_numbers<[1], [0], [0], [1], [0, 0, 1, 1], [], []>} : vector<4x4xf32>, vector<4x384xf32>, vector<4x384xf32> -> vector<4x384xf32>
    %51 = arith.addf %45, %50 : vector<4x384xf32>
    %c8 = arith.constant 8 : index
    %c0_44 = arith.constant 0 : index
    %c0_45 = arith.constant 0 : index
    %52 = vector.load %arg3[%c8, %c0_44, %c0_45] : memref<9x4x4xf32, #tpu.memory_space<vmem>>, vector<1x4x4xf32>
    %53 = vector.shape_cast %52 : vector<1x4x4xf32> to vector<4x4xf32>
    %c0_46 = arith.constant 0 : index
    %c0_47 = arith.constant 0 : index
    %c147 = arith.constant 147 : index
    %54 = vector.load %arg1[%c0_46, %c0_47, %c147] : memref<1x4x640xf32, #tpu.memory_space<vmem>>, vector<1x4x384xf32>
    %55 = vector.shape_cast %54 : vector<1x4x384xf32> to vector<4x384xf32>
    %cst_48 = arith.constant dense<0.000000e+00> : vector<4x384xf32>
    %56 = tpu.matmul %53, %55, %cst_48 {dimension_numbers = #tpu.dot_dimension_numbers<[1], [0], [0], [1], [0, 0, 1, 1], [], []>} : vector<4x4xf32>, vector<4x384xf32>, vector<4x384xf32> -> vector<4x384xf32>
    %57 = arith.addf %51, %56 : vector<4x384xf32>
    %c0_49 = arith.constant 0 : index
    %c0_50 = arith.constant 0 : index
    %58 = vector.load %arg4[%c0_49, %c0_50] : memref<4x1xf32, #tpu.memory_space<vmem>>, vector<4x1xf32>
    %59 = vector.broadcast %58 : vector<4x1xf32> to vector<4x384xf32>
    %60 = arith.addf %57, %59 : vector<4x384xf32>
    %cst_51 = arith.constant 0.000000e+00 : f32
    %61 = vector.broadcast %cst_51 : f32 to vector<4x384xf32>
    %62 = arith.maximumf %60, %61 : vector<4x384xf32>
    %c0_52 = arith.constant 0 : index
    %c0_53 = arith.constant 0 : index
    %63 = vector.load %arg2[%c0_52, %c0_53] : memref<1x384xf32, #tpu.memory_space<vmem>>, vector<1x384xf32>
    %64 = vector.broadcast %63 : vector<1x384xf32> to vector<4x384xf32>
    %65 = arith.mulf %62, %64 : vector<4x384xf32>
    %c0_54 = arith.constant 0 : index
    %c128_55 = arith.constant 128 : index
    %66 = vector.load %arg8[%c0_54, %c128_55] : memref<4x640xf32, #tpu.memory_space<vmem>>, vector<4x384xf32>
    tpu.vector_store %arg8[%c0_54, %c128_55], %65 {strides = array<i32>} : memref<4x640xf32, #tpu.memory_space<vmem>>, vector<4x384xf32>,
    %cst_56 = arith.constant 0.000000e+00 : f32
    %67 = vector.broadcast %cst_56 : f32 to vector<4x384xf32>
    %c0_57 = arith.constant 0 : index
    %c0_58 = arith.constant 0 : index
    %c0_59 = arith.constant 0 : index
    %68 = vector.load %arg5[%c0_57, %c0_58, %c0_59] : memref<9x4x4xf32, #tpu.memory_space<vmem>>, vector<1x4x4xf32>
    %69 = vector.shape_cast %68 : vector<1x4x4xf32> to vector<4x4xf32>
    %c0_60 = arith.constant 0 : index
    %c109_61 = arith.constant 109 : index
    %70 = vector.load %arg8[%c0_60, %c109_61] : memref<4x640xf32, #tpu.memory_space<vmem>>, vector<4x384xf32>
    %cst_62 = arith.constant dense<0.000000e+00> : vector<4x384xf32>
    %71 = tpu.matmul %69, %70, %cst_62 {dimension_numbers = #tpu.dot_dimension_numbers<[1], [0], [0], [1], [0, 0, 1, 1], [], []>} : vector<4x4xf32>, vector<4x384xf32>, vector<4x384xf32> -> vector<4x384xf32>
    %72 = arith.addf %67, %71 : vector<4x384xf32>
    %c1_63 = arith.constant 1 : index
    %c0_64 = arith.constant 0 : index
    %c0_65 = arith.constant 0 : index
    %73 = vector.load %arg5[%c1_63, %c0_64, %c0_65] : memref<9x4x4xf32, #tpu.memory_space<vmem>>, vector<1x4x4xf32>
    %74 = vector.shape_cast %73 : vector<1x4x4xf32> to vector<4x4xf32>
    %c0_66 = arith.constant 0 : index
    %c110_67 = arith.constant 110 : index
    %75 = vector.load %arg8[%c0_66, %c110_67] : memref<4x640xf32, #tpu.memory_space<vmem>>, vector<4x384xf32>
    %cst_68 = arith.constant dense<0.000000e+00> : vector<4x384xf32>
    %76 = tpu.matmul %74, %75, %cst_68 {dimension_numbers = #tpu.dot_dimension_numbers<[1], [0], [0], [1], [0, 0, 1, 1], [], []>} : vector<4x4xf32>, vector<4x384xf32>, vector<4x384xf32> -> vector<4x384xf32>
    %77 = arith.addf %72, %76 : vector<4x384xf32>
    %c2_69 = arith.constant 2 : index
    %c0_70 = arith.constant 0 : index
    %c0_71 = arith.constant 0 : index
    %78 = vector.load %arg5[%c2_69, %c0_70, %c0_71] : memref<9x4x4xf32, #tpu.memory_space<vmem>>, vector<1x4x4xf32>
    %79 = vector.shape_cast %78 : vector<1x4x4xf32> to vector<4x4xf32>
    %c0_72 = arith.constant 0 : index
    %c111_73 = arith.constant 111 : index
    %80 = vector.load %arg8[%c0_72, %c111_73] : memref<4x640xf32, #tpu.memory_space<vmem>>, vector<4x384xf32>
    %cst_74 = arith.constant dense<0.000000e+00> : vector<4x384xf32>
    %81 = tpu.matmul %79, %80, %cst_74 {dimension_numbers = #tpu.dot_dimension_numbers<[1], [0], [0], [1], [0, 0, 1, 1], [], []>} : vector<4x4xf32>, vector<4x384xf32>, vector<4x384xf32> -> vector<4x384xf32>
    %82 = arith.addf %77, %81 : vector<4x384xf32>
    %c3_75 = arith.constant 3 : index
    %c0_76 = arith.constant 0 : index
    %c0_77 = arith.constant 0 : index
    %83 = vector.load %arg5[%c3_75, %c0_76, %c0_77] : memref<9x4x4xf32, #tpu.memory_space<vmem>>, vector<1x4x4xf32>
    %84 = vector.shape_cast %83 : vector<1x4x4xf32> to vector<4x4xf32>
    %c0_78 = arith.constant 0 : index
    %c127_79 = arith.constant 127 : index
    %85 = vector.load %arg8[%c0_78, %c127_79] : memref<4x640xf32, #tpu.memory_space<vmem>>, vector<4x384xf32>
    %cst_80 = arith.constant dense<0.000000e+00> : vector<4x384xf32>
    %86 = tpu.matmul %84, %85, %cst_80 {dimension_numbers = #tpu.dot_dimension_numbers<[1], [0], [0], [1], [0, 0, 1, 1], [], []>} : vector<4x4xf32>, vector<4x384xf32>, vector<4x384xf32> -> vector<4x384xf32>
    %87 = arith.addf %82, %86 : vector<4x384xf32>
    %c4_81 = arith.constant 4 : index
    %c0_82 = arith.constant 0 : index
    %c0_83 = arith.constant 0 : index
    %88 = vector.load %arg5[%c4_81, %c0_82, %c0_83] : memref<9x4x4xf32, #tpu.memory_space<vmem>>, vector<1x4x4xf32>
    %89 = vector.shape_cast %88 : vector<1x4x4xf32> to vector<4x4xf32>
    %c0_84 = arith.constant 0 : index
    %c128_85 = arith.constant 128 : index
    %90 = vector.load %arg8[%c0_84, %c128_85] : memref<4x640xf32, #tpu.memory_space<vmem>>, vector<4x384xf32>
    %cst_86 = arith.constant dense<0.000000e+00> : vector<4x384xf32>
    %91 = tpu.matmul %89, %90, %cst_86 {dimension_numbers = #tpu.dot_dimension_numbers<[1], [0], [0], [1], [0, 0, 1, 1], [], []>} : vector<4x4xf32>, vector<4x384xf32>, vector<4x384xf32> -> vector<4x384xf32>
    %92 = arith.addf %87, %91 : vector<4x384xf32>
    %c5_87 = arith.constant 5 : index
    %c0_88 = arith.constant 0 : index
    %c0_89 = arith.constant 0 : index
    %93 = vector.load %arg5[%c5_87, %c0_88, %c0_89] : memref<9x4x4xf32, #tpu.memory_space<vmem>>, vector<1x4x4xf32>
    %94 = vector.shape_cast %93 : vector<1x4x4xf32> to vector<4x4xf32>
    %c0_90 = arith.constant 0 : index
    %c129_91 = arith.constant 129 : index
    %95 = vector.load %arg8[%c0_90, %c129_91] : memref<4x640xf32, #tpu.memory_space<vmem>>, vector<4x384xf32>
    %cst_92 = arith.constant dense<0.000000e+00> : vector<4x384xf32>
    %96 = tpu.matmul %94, %95, %cst_92 {dimension_numbers = #tpu.dot_dimension_numbers<[1], [0], [0], [1], [0, 0, 1, 1], [], []>} : vector<4x4xf32>, vector<4x384xf32>, vector<4x384xf32> -> vector<4x384xf32>
    %97 = arith.addf %92, %96 : vector<4x384xf32>
    %c6_93 = arith.constant 6 : index
    %c0_94 = arith.constant 0 : index
    %c0_95 = arith.constant 0 : index
    %98 = vector.load %arg5[%c6_93, %c0_94, %c0_95] : memref<9x4x4xf32, #tpu.memory_space<vmem>>, vector<1x4x4xf32>
    %99 = vector.shape_cast %98 : vector<1x4x4xf32> to vector<4x4xf32>
    %c0_96 = arith.constant 0 : index
    %c145_97 = arith.constant 145 : index
    %100 = vector.load %arg8[%c0_96, %c145_97] : memref<4x640xf32, #tpu.memory_space<vmem>>, vector<4x384xf32>
    %cst_98 = arith.constant dense<0.000000e+00> : vector<4x384xf32>
    %101 = tpu.matmul %99, %100, %cst_98 {dimension_numbers = #tpu.dot_dimension_numbers<[1], [0], [0], [1], [0, 0, 1, 1], [], []>} : vector<4x4xf32>, vector<4x384xf32>, vector<4x384xf32> -> vector<4x384xf32>
    %102 = arith.addf %97, %101 : vector<4x384xf32>
    %c7_99 = arith.constant 7 : index
    %c0_100 = arith.constant 0 : index
    %c0_101 = arith.constant 0 : index
    %103 = vector.load %arg5[%c7_99, %c0_100, %c0_101] : memref<9x4x4xf32, #tpu.memory_space<vmem>>, vector<1x4x4xf32>
    %104 = vector.shape_cast %103 : vector<1x4x4xf32> to vector<4x4xf32>
    %c0_102 = arith.constant 0 : index
    %c146_103 = arith.constant 146 : index
    %105 = vector.load %arg8[%c0_102, %c146_103] : memref<4x640xf32, #tpu.memory_space<vmem>>, vector<4x384xf32>
    %cst_104 = arith.constant dense<0.000000e+00> : vector<4x384xf32>
    %106 = tpu.matmul %104, %105, %cst_104 {dimension_numbers = #tpu.dot_dimension_numbers<[1], [0], [0], [1], [0, 0, 1, 1], [], []>} : vector<4x4xf32>, vector<4x384xf32>, vector<4x384xf32> -> vector<4x384xf32>
    %107 = arith.addf %102, %106 : vector<4x384xf32>
    %c8_105 = arith.constant 8 : index
    %c0_106 = arith.constant 0 : index
    %c0_107 = arith.constant 0 : index
    %108 = vector.load %arg5[%c8_105, %c0_106, %c0_107] : memref<9x4x4xf32, #tpu.memory_space<vmem>>, vector<1x4x4xf32>
    %109 = vector.shape_cast %108 : vector<1x4x4xf32> to vector<4x4xf32>
    %c0_108 = arith.constant 0 : index
    %c147_109 = arith.constant 147 : index
    %110 = vector.load %arg8[%c0_108, %c147_109] : memref<4x640xf32, #tpu.memory_space<vmem>>, vector<4x384xf32>
    %cst_110 = arith.constant dense<0.000000e+00> : vector<4x384xf32>
    %111 = tpu.matmul %109, %110, %cst_110 {dimension_numbers = #tpu.dot_dimension_numbers<[1], [0], [0], [1], [0, 0, 1, 1], [], []>} : vector<4x4xf32>, vector<4x384xf32>, vector<4x384xf32> -> vector<4x384xf32>
    %112 = arith.addf %107, %111 : vector<4x384xf32>
    %c0_111 = arith.constant 0 : index
    %c0_112 = arith.constant 0 : index
    %113 = vector.load %arg6[%c0_111, %c0_112] : memref<4x1xf32, #tpu.memory_space<vmem>>, vector<4x1xf32>
    %114 = vector.broadcast %113 : vector<4x1xf32> to vector<4x384xf32>
    %115 = arith.addf %112, %114 : vector<4x384xf32>
    %c0_113 = arith.constant 0 : index
    %c0_114 = arith.constant 0 : index
    %c128_115 = arith.constant 128 : index
    %116 = vector.load %arg1[%c0_113, %c0_114, %c128_115] : memref<1x4x640xf32, #tpu.memory_space<vmem>>, vector<1x4x384xf32>
    %117 = vector.shape_cast %116 : vector<1x4x384xf32> to vector<4x384xf32>
    %118 = arith.addf %115, %117 : vector<4x384xf32>
    %cst_116 = arith.constant 0.000000e+00 : f32
    %119 = vector.broadcast %cst_116 : f32 to vector<4x384xf32>
    %120 = arith.maximumf %118, %119 : vector<4x384xf32>
    %c0_117 = arith.constant 0 : index
    %c0_118 = arith.constant 0 : index
    %c0_119 = arith.constant 0 : index
    %121 = vector.load %arg7[%c0_117, %c0_118, %c0_119] : memref<1x4x384xf32, #tpu.memory_space<vmem>>, vector<1x4x384xf32>
    %122 = vector.shape_cast %121 : vector<1x4x384xf32> to vector<4x384xf32>
    %123 = vector.shape_cast %120 : vector<4x384xf32> to vector<1x4x384xf32>
    tpu.vector_store %arg7[%c0_117, %c0_118, %c0_119], %123 {strides = array<i32>} : memref<1x4x384xf32, #tpu.memory_space<vmem>>, vector<1x4x384xf32>,
    return
  }
  func.func @transform_0(%arg0: i32) -> (i32, i32, i32) {
    %c0_i32 = arith.constant 0 : i32
    %c0_i32_0 = arith.constant 0 : i32
    %c0_i32_1 = arith.constant 0 : i32
    return %arg0, %c0_i32, %c0_i32_0 : i32, i32, i32
  }
  func.func @transform_1(%arg0: i32) -> (i32, i32) {
    %c0_i32 = arith.constant 0 : i32
    %c0_i32_0 = arith.constant 0 : i32
    %c0_i32_1 = arith.constant 0 : i32
    return %c0_i32, %c0_i32_0 : i32, i32
  }
  func.func @transform_2(%arg0: i32) -> (i32, i32, i32) {
    %c0_i32 = arith.constant 0 : i32
    %c0_i32_0 = arith.constant 0 : i32
    %c0_i32_1 = arith.constant 0 : i32
    %c0_i32_2 = arith.constant 0 : i32
    return %c0_i32, %c0_i32_0, %c0_i32_1 : i32, i32, i32
  }
  func.func @transform_3(%arg0: i32) -> (i32, i32) {
    %c0_i32 = arith.constant 0 : i32
    %c0_i32_0 = arith.constant 0 : i32
    %c0_i32_1 = arith.constant 0 : i32
    return %c0_i32, %c0_i32_0 : i32, i32
  }
  func.func @transform_4(%arg0: i32) -> (i32, i32, i32) {
    %c0_i32 = arith.constant 0 : i32
    %c0_i32_0 = arith.constant 0 : i32
    %c0_i32_1 = arith.constant 0 : i32
    %c0_i32_2 = arith.constant 0 : i32
    return %c0_i32, %c0_i32_0, %c0_i32_1 : i32, i32, i32
  }
  func.func @transform_5(%arg0: i32) -> (i32, i32) {
    %c0_i32 = arith.constant 0 : i32
    %c0_i32_0 = arith.constant 0 : i32
    %c0_i32_1 = arith.constant 0 : i32
    return %c0_i32, %c0_i32_0 : i32, i32
  }
  func.func @transform_6(%arg0: i32) -> (i32, i32, i32) {
    %c0_i32 = arith.constant 0 : i32
    %c0_i32_0 = arith.constant 0 : i32
    %c0_i32_1 = arith.constant 0 : i32
    return %arg0, %c0_i32, %c0_i32_0 : i32, i32, i32
  }
}

</mosaic_0001>

<bundles_post_ra>
// kernel: tpu_custom_call.1
= control target key start
LH: loop header
LB: loop body
LE: loop exit
PB: predicated region body
PF: predicated region fallthrough
CT: control target
= control target key end

     0   :  { %11 = vsyncpa [#allocation4], 0  ;;  %s4371_s0 = inlined_call_operand.vmem [shape: f32[2,4,640], index: 0, kind: input, shape index: {}]   ;;  %s4372_s1 = inlined_call_operand.vmem [shape: f32[1,384], index: 1, kind: input, shape index: {}]   ;;  %s4373_s2 = inlined_call_operand.vmem [shape: f32[9,4,4], index: 2, kind: input, shape index: {}]   ;;  %s4374_s3 = inlined_call_operand.vmem [shape: f32[4,1], index: 3, kind: input, shape index: {}]   ;;  %s4375_s4 = inlined_call_operand.vmem [shape: f32[9,4,4], index: 4, kind: input, shape index: {}]   ;;  %s4376_s5 = inlined_call_operand.vmem [shape: f32[4,1], index: 5, kind: input, shape index: {}]   ;;  %s4377_s6 = inlined_call_operand.hbm [shape: f32[2,4,384], index: 6, kind: output, shape index: {}]  }
   0x1   :  { %13 = vsyncpa [#allocation4 + $0x1], 0  ;;  %s3891_s21 = smov 0   ;;  %s3893_s22 = smov 0  }
   0x2   :  { %s3895_s23 = smov 0   ;;  %s3897_s24 = smov 0  }
   0x3 LB: > { %s3912_s25 = sadd.s32 4294967295, %s3842_s24   ;;  %s3446_s26 = sadd.s32 4294967294, %s3842_s24   ;;  %s3842_s24 = sphi %s3897_s24, %s4383_s24   ;;  %s3838_s23 = sphi %s3895_s23, %s4382_s23   ;;  %s3834_s22 = sphi %s3893_s22, %s4381_s22   ;;  %s3830_s21 = sphi %s3891_s21, %s4380_s21  }
   0x4   : > { %s3916_s27 = sadd.s32 1, %s3842_s24   ;;  %s157_s28 = sadd.s32 1, %s3838_s23 }
   0x5   : > { %s154_s29 = ssub.s32 %s3842_s24, %s3916_s27  ;;  %p167_p0 = scmp.ne.s32.totalorder %s3838_s23, %s3834_s22 }
   0x6   : > { %p155_p1 = scmp.eq.s32.totalorder %s154_s29, 0  ;;  %p168_p2 = scmp.eq.s32.totalorder %s3912_s25, 1 }
   0x7   : > { %p173_p3 = scmp.ne.s32.totalorder %s3834_s22, %s3830_s21  ;;  %p174_p4 = scmp.eq.s32.totalorder %s3446_s26, 1 }
   0x8   : > { %s3927_s30 = scalar_select %p155_p1, %s3838_s23, %s157_s28  }
   0x9   : > { %p3929_p5 = por %p168_p2, %p167_p0  ;;  %p3933_p6 = por %p174_p4, %p173_p3 }
   0xa   : > { %p3449_p7 = scmp.ge.s32.totalorder %s3842_s24, 1  ;;  %p215_p8 = scmp.lt.s32.totalorder %s3842_s24, 3 }
   0xc   : > { %p216_p9 = pnand %p3449_p7, %p215_p8 }
   0xd   : > { %p245_p10 = scmp.lt.s32.totalorder (!%p216_p9), %s3912_s25, 1  ;;  %v3844_v0 = vmov (!%p216_p9), 0.0   ;;  %s3845_s14 = smov (!%p216_p9), 18   ;;  %vm3848_vm0 = vmmov (!%p216_p9), 0   ;;  %v3854_v9 = vmov (!%p216_p9), 0   ;;  %vm269_vm1 = vcmask (!%p216_p9), 146432  }
   0xe   : > { %219 = sbr.rel (%p216_p9) target bundleno = 867 (0x363), region = 44  ;;  %348 = vmatprep.mubr.f32.mxu0 (!%p216_p9), %v3844_v0  ;;  %250 = vst [vmem:[#allocation2] sm:$0xf] (!%p216_p9), %v3844_v0  ;;  %251 = vst [vmem:[#allocation2 + $0x10] sm:$0xf] (!%p216_p9), %v3844_v0  ;;  %3596 = vmatprep.subr.mxu1 (!%p216_p9), %v3844_v0  ;;  %s3846_s15 = smov (!%p216_p9), 19  }
   0xf   : > { %s3847_s16 = smov (!%p216_p9), 17   ;;  %3598 = vmatprep.mubr.msk.f32.mxu1 (!%p216_p9), %vm3848_vm0, %v3844_v0  ;;  %s3849_s17 = smov (!%p216_p9), 1   ;;  %3771 = vset.pattern.permute.xlu0 (!%p216_p9), %v3854_v9  ;;  %v1785_v10 = vld [vmem:[%s4374_s3] sm:$0xf] (!%p216_p9)  ;;  %vm277_vm2 = vcmask (!%p216_p9), 1043456   ;;  %vm433_vm3 = vcmask (!%p216_p9), 154624  }
  0x10   : > { %s3850_s18 = smov (!%p216_p9), 127   ;;  %s3851_s19 = smov (!%p216_p9), 111   ;;  %v3451_v16 = vld [vmem:[%s4373_s2 + $0x4] sm:$0xf] (!%p216_p9)  ;;  %vm273_vm4 = vcmask (!%p216_p9), 31744   ;;  %vm603_vm5 = vcmask (!%p216_p9), 138240  }
  0x11   : > { %s3852_s20 = smov (!%p216_p9), 110   ;;  %s3853_s26 = smov (!%p216_p9), 109   ;;  %v252_v25 = vld [vmem:[%s4373_s2] sm:$0xf] (!%p216_p9)  ;;  %vm776_vm6 = vcmask (!%p216_p9), 7168   ;;  %vm1109_vm7 = vcmask (!%p216_p9), 1039360  }
  0x12   : > { %v3462_v32 = vld [vmem:[%s4373_s2 + $0x8] sm:$0xf] (!%p216_p9)  ;;  %v3468_v40 = vld [vmem:[%s4373_s2 + $0xc] sm:$0xf] (!%p216_p9)  ;;  %v3474_v48 = vld [vmem:[%s4373_s2 + $0x10] sm:$0xf] (!%p216_p9) }
  0x13   : > { %vm1282_vm8 = vcmask (!%p216_p9), 908288   ;;  %v3480_v57 = vld [vmem:[%s4373_s2 + $0x14] sm:$0xf] (!%p216_p9)  ;;  %vm1455_vm9 = vcmask (!%p216_p9), 900096   ;;  %vm1628_vm10 = vcmask (!%p216_p9), 891904   ;;  %s3720_s12 = smul.u32 (!%p216_p9), 192, %s3912_s25 }
  0x15   : > { %s246_s9 = scalar_select %p245_p10, %s3912_s25, 1 }
  0x16   : > { %s3855_s25 = smov [#allocation3]  }
  0x17   : > { %s3719_s10 = smul.u32 20, %s246_s9  ;;  %s4329_s9 = scalar_lea.hbm %s4377_s6, %s3720_s12 }
  0x19   : > { %s3948_s13 = scalar_lea.vmem %s4371_s0, %s3719_s10 }
  0x1a   : > { %v253_v1 = vld [vmem:[%s3948_s13] sm:$0xff]  ;;  %v254_v3 = vld [vmem:[%s3948_s13 + $0x8] sm:$0xff] }
  0x1b   : > { %261 = vrot.lane.b32.xlu1 %v253_v1, %s3845_s14  ;;  %v259_v2 = vcombine.high %v253_v1, %v253_v1  ;;  %v594_v4 = vcombine.high %v254_v3, %v254_v3  ;;  %v3967_v5 = vld [vmem:[%s3948_s13 + $0x4] sm:$0xff]  ;;  %v1096_v6 = vld [vmem:[%s3948_s13 + $0xc] sm:$0xff] }
  0x1c   : > { %v3974_v7 = vcombine.high %v3967_v5, %v3967_v5  ;;  %v1100_v8 = vcombine.high %v1096_v6, %v1096_v6  ;;  %v936_v49 = vld [vmem:[%s3948_s13 + $0xc] sm:$0xf] }
  0x1d   : > { %263 = vrot.lane.b32.xlu0 %v259_v2, %s3845_s14 }
  0x1f   : > { %427 = vrot.lane.b32.xlu1 %v259_v2, %s3846_s15 }
  0x21   : > { %265 = vrot.lane.b32.xlu0 %v254_v3, %s3845_s14 }
  0x23   : > { %425 = vrot.lane.b32.xlu1 %v253_v1, %s3846_s15 }
  0x25   : > { %429 = vrot.lane.b32.xlu0 %v254_v3, %s3846_s15 }
  0x27   : > { %599 = vrot.lane.b32.xlu1 %v254_v3, %s3847_s16 }
  0x29   : > { %597 = vrot.lane.b32.xlu0 %v259_v2, %s3847_s16 }
  0x2b   : > { %770 = vrot.lane.b32.xlu1 %v259_v2, %s3849_s17 }
  0x2d   : > { %595 = vrot.lane.b32.xlu0 %v253_v1, %s3847_s16 }
  0x2f   : > { %768 = vrot.lane.b32.xlu1 %v253_v1, %s3849_s17  ;;  %v3486_v1 = vld [vmem:[%s4373_s2 + $0x18] sm:$0xf] }
  0x31   : > { %772 = vrot.lane.b32.xlu0 %v254_v3, %s3849_s17 }
  0x33   : > { %431 = vrot.lane.b32.xlu1 %v594_v4, %s3846_s15 }
  0x35   : > { %267 = vrot.lane.b32.xlu0 %v594_v4, %s3845_s14 }
  0x37   : > { %1105 = vrot.lane.b32.xlu1 %v1096_v6, %s3850_s18 }
  0x39   : > { %1103 = vrot.lane.b32.xlu0 %v3974_v7, %s3850_s18 }
  0x3b   : > { %601 = vrot.lane.b32.xlu1 %v594_v4, %s3847_s16 }
  0x3d   : > { %1101 = vrot.lane.b32.xlu0 %v3967_v5, %s3850_s18 }
  0x3f   : > { %1276 = vrot.lane.b32.xlu1 %v3974_v7, %s3851_s19 }
  0x41   : > { %774 = vrot.lane.b32.xlu0 %v594_v4, %s3849_s17 }
  0x43   : > { %1274 = vrot.lane.b32.xlu1 %v3967_v5, %s3851_s19 }
  0x45   : > { %1278 = vrot.lane.b32.xlu0 %v1096_v6, %s3851_s19 }
  0x47   : > { %1449 = vrot.lane.b32.xlu1 %v3974_v7, %s3852_s20 }
  0x49   : > { %1107 = vrot.lane.b32.xlu0 %v1100_v8, %s3850_s18 }
  0x4b   : > { %1447 = vrot.lane.b32.xlu1 %v3967_v5, %s3852_s20 }
  0x4d   : > { %1451 = vrot.lane.b32.xlu0 %v1096_v6, %s3852_s20 }
  0x4f   : > { %1453 = vrot.lane.b32.xlu1 %v1100_v8, %s3852_s20 }
  0x51   : > { %1280 = vrot.lane.b32.xlu0 %v1100_v8, %s3851_s19 }
  0x53   : > { %1624 = vrot.lane.b32.xlu1 %v1096_v6, %s3853_s26 }
  0x55   : > { %1622 = vrot.lane.b32.xlu0 %v3974_v7, %s3853_s26 }
  0x57   : > { %1626 = vrot.lane.b32.xlu1 %v1100_v8, %s3853_s26  ;;  %v3492_v8 = vld [vmem:[%s4373_s2 + $0x1c] sm:$0xf] }
  0x59   : > { %1620 = vrot.lane.b32.xlu0 %v3967_v5, %s3853_s26 }
  0x5d   : > { %1788 = vperm.xlu0 %3771, %v1785_v10  }
  0x8d   : > { %v262_v11 = vpop.permute.xlu1 %261 }
  0x8f   : > { %v264_v12 = vpop.permute.xlu0 %263 }
  0x90   : > { %v270_v18 = vsel %vm269_vm1, %v262_v11, %v264_v12 }
  0x91   : > { %v428_v13 = vpop.permute.xlu1 %427 }
  0x93   : > { %v266_v14 = vpop.permute.xlu0 %265 }
  0x94   : > { %v271_v15 = vsel %vm269_vm1, %v264_v12, %v266_v14 }
  0x95   : > { %v426_v17 = vpop.permute.xlu1 %425  ;;  %3452 = vmatprep.subr.msk.mxu0 %vm277_vm2, %v271_v15 }
  0x96   : > { %3453 = vmatpush1.msk.msra.mxu0 %vm277_vm2, %v270_v18  ;;  %v434_v19 = vsel %vm433_vm3, %v426_v17, %v428_v13 }
  0x97   : > { %3454 = vmatmul.mubr.msk.f32.vlgmr.msra.gmra.mrb[0].mxu0 %vm273_vm4, %v3451_v16  ;;  %v430_v20 = vpop.permute.xlu0 %429 }
  0x98   : > { %v435_v21 = vsel %vm433_vm3, %v428_v13, %v430_v20  ;;  %510 = vmatprep.mubr.f32.mxu0 %v3844_v0  ;;  %v3498_v13 = vld [vmem:[%s4373_s2 + $0x20] sm:$0xf] }
  0x99   : > { %v600_v22 = vpop.permute.xlu1 %599  ;;  %3457 = vmatprep.subr.msk.mxu0 %vm277_vm2, %v435_v21 }
  0x9a   : > { %3458 = vmatpush1.msk.msra.mxu0 %vm277_vm2, %v434_v19 }
  0x9b   : > { %v598_v23 = vpop.permute.xlu0 %597 }
  0x9c   : > { %v605_v24 = vsel %vm603_vm5, %v598_v23, %v600_v22 }
  0x9d   : > { %v771_v26 = vpop.permute.xlu1 %770  ;;  %3463 = vmatprep.subr.msk.mxu0 %vm277_vm2, %v605_v24 }
  0x9f   : > { %3459 = vmatmul.mubr.msk.f32.vlgmr.msra.gmra.mrb[0].mxu0 %vm273_vm4, %v252_v25  ;;  %v596_v27 = vpop.permute.xlu0 %595 }
  0xa0   : > { %v604_v28 = vsel %vm603_vm5, %v596_v27, %v598_v23  ;;  %680 = vmatprep.mubr.f32.mxu0 %v3844_v0 }
  0xa1   : > { %v769_v29 = vpop.permute.xlu1 %768  ;;  %3464 = vmatpush1.msk.msra.mxu0 %vm277_vm2, %v604_v28 }
  0xa2   : > { %v777_v33 = vsel %vm776_vm6, %v769_v29, %v771_v26 }
  0xa3   : > { %v773_v30 = vpop.permute.xlu0 %772 }
  0xa4   : > { %v778_v31 = vsel %vm776_vm6, %v771_v26, %v773_v30 }
  0xa5   : > { %v432_v34 = vpop.permute.xlu1 %431  ;;  %3469 = vmatprep.subr.msk.mxu0 %vm277_vm2, %v778_v31 }
  0xa6   : > { %v436_v38 = vsel %vm433_vm3, %v430_v20, %v432_v34 }
  0xa7   : > { %3465 = vmatmul.mubr.msk.f32.vlgmr.msra.gmra.mrb[0].mxu0 %vm273_vm4, %v3462_v32  ;;  %v268_v35 = vpop.permute.xlu0 %267 }
  0xa8   : > { %v272_v36 = vsel %vm269_vm1, %v266_v14, %v268_v35  ;;  %3470 = vmatpush1.msk.msra.mxu0 %vm277_vm2, %v777_v33  ;;  %853 = vmatprep.mubr.f32.mxu0 %v3844_v0  ;;  %v1799_v33 = vlaneseq }
  0xa9   : > { %v1106_v37 = vpop.permute.xlu1 %1105  ;;  %3597 = vmatpush3.msk.msra.mxu1 %vm277_vm2, %v272_v36  ;;  %3475 = vmatprep.subr.msk.mxu0 %vm277_vm2, %v3974_v7 }
  0xaa   : > { %3601 = vmatprep.subr.mxu1 %v3844_v0  ;;  %3599 = vmatmul.mubr.msk.f32.vlgmr.msra.gmra.mrb[0].mxu1 %vm273_vm4, %v3451_v16 }
  0xab   : > { %3602 = vmatpush3.msk.msra.mxu1 %vm277_vm2, %v436_v38  ;;  %v1104_v39 = vpop.permute.xlu0 %1103  ;;  %3603 = vmatprep.mubr.msk.f32.mxu1 %vm3848_vm0, %v3844_v0 }
  0xac   : > { %3606 = vmatprep.subr.mxu1 %v3844_v0  ;;  %v1111_v43 = vsel %vm1109_vm7, %v1104_v39, %v1106_v37 }
  0xad   : > { %v602_v41 = vpop.permute.xlu1 %601 }
  0xae   : > { %v606_v42 = vsel %vm603_vm5, %v600_v22, %v602_v41  ;;  %3604 = vmatmul.mubr.msk.f32.vlgmr.msra.gmra.mrb[2].mxu1 %vm273_vm4, %v252_v25 }
  0xaf   : > { %3607 = vmatpush3.msk.msra.mxu1 %vm277_vm2, %v606_v42  ;;  %3471 = vmatmul.mubr.msk.f32.vlgmr.msra.gmra.mrb[0].mxu0 %vm273_vm4, %v3468_v40  ;;  %v1102_v44 = vpop.permute.xlu0 %1101 }
  0xb0   : > { %3608 = vmatprep.mubr.msk.f32.mxu1 %vm3848_vm0, %v3844_v0  ;;  %3611 = vmatprep.subr.mxu1 %v3844_v0  ;;  %v1110_v50 = vsel %vm1109_vm7, %v1102_v44, %v1104_v39 }
  0xb1   : > { %v1277_v45 = vpop.permute.xlu1 %1276  ;;  %3476 = vmatpush1.msk.msra.mxu0 %vm277_vm2, %v3967_v5  ;;  %1013 = vmatprep.mubr.f32.mxu0 %v3844_v0 }
  0xb2   : > { %3609 = vmatmul.mubr.msk.f32.vlgmr.msra.gmra.mrb[4].mxu1 %vm273_vm4, %v3462_v32  ;;  %3481 = vmatprep.subr.msk.mxu0 %vm277_vm2, %v1111_v43  ;;  %v1797_v43 = vld [vmem:[%s4372_s1] sm:$0x7] }
  0xb3   : > { %v775_v46 = vpop.permute.xlu0 %774  ;;  %3613 = vmatprep.mubr.msk.f32.mxu1 %vm3848_vm0, %v3844_v0 }
  0xb4   : > { %v779_v47 = vsel %vm776_vm6, %v773_v30, %v775_v46 }
  0xb5   : > { %3612 = vmatpush3.msk.msra.mxu1 %vm277_vm2, %v779_v47  ;;  %v1275_v51 = vpop.permute.xlu1 %1274 }
  0xb6   : > { %3614 = vmatmul.mubr.msk.f32.vlgmr.msra.gmra.mrb[6].mxu1 %vm273_vm4, %v3468_v40  ;;  %3616 = vmatprep.subr.mxu1 %v3844_v0  ;;  %v1283_v58 = vsel %vm1282_vm8, %v1275_v51, %v1277_v45 }
  0xb7   : > { %3477 = vmatmul.mubr.msk.f32.vlgmr.msra.gmra.mrb[0].mxu0 %vm273_vm4, %v3474_v48  ;;  %v1279_v52 = vpop.permute.xlu0 %1278  ;;  %3617 = vmatpush3.msk.msra.mxu1 %vm277_vm2, %v936_v49 }
  0xb8   : > { %3482 = vmatpush1.msk.msra.mxu0 %vm277_vm2, %v1110_v50  ;;  %v1284_v53 = vsel %vm1282_vm8, %v1277_v45, %v1279_v52  ;;  %3618 = vmatprep.mubr.msk.f32.mxu1 %vm3848_vm0, %v3844_v0 }
  0xb9   : > { %v1450_v54 = vpop.permute.xlu1 %1449  ;;  %3621 = vmatprep.subr.mxu1 %v3844_v0  ;;  %1186 = vmatprep.mubr.f32.mxu0 %v3844_v0 }
  0xba   : > { %3619 = vmatmul.mubr.msk.f32.vlgmr.msra.gmra.mrb[8].mxu1 %vm273_vm4, %v3474_v48  ;;  %3487 = vmatprep.subr.msk.mxu0 %vm277_vm2, %v1284_v53 }
  0xbb   : > { %v1108_v55 = vpop.permute.xlu0 %1107  ;;  %3623 = vmatprep.mubr.msk.f32.mxu1 %vm3848_vm0, %v3844_v0 }
  0xbc   : > { %v1112_v56 = vsel %vm1109_vm7, %v1106_v37, %v1108_v55  ;;  %v1800_v37 = vshrl.u32 %v1799_v33, 7 }
  0xbd   : > { %3622 = vmatpush3.msk.msra.mxu1 %vm277_vm2, %v1112_v56  ;;  %v1448_v59 = vpop.permute.xlu1 %1447 }
  0xbe   : > { %3624 = vmatmul.mubr.msk.f32.vlgmr.msra.gmra.mrb[10].mxu1 %vm273_vm4, %v3480_v57  ;;  %3626 = vmatprep.subr.mxu1 %v3844_v0  ;;  %v1456_v4 = vsel %vm1455_vm9, %v1448_v59, %v1450_v54  ;;  %v1809_v41 = vsub.s32 2, %v1800_v37  ;;  %v1801_v50 = vsub.s32 0, %v1800_v37 }
  0xbf   : > { %3483 = vmatmul.mubr.msk.f32.vlgmr.msra.gmra.mrb[0].mxu0 %vm273_vm4, %v3480_v57  ;;  %v1452_v60 = vpop.permute.xlu0 %1451  ;;  %3628 = vmatprep.mubr.msk.f32.mxu1 %vm3848_vm0, %v3844_v0 }
  0xc0   : > { %v1457_v61 = vsel %vm1455_vm9, %v1450_v54, %v1452_v60  ;;  %3488 = vmatpush1.msk.msra.mxu0 %vm277_vm2, %v1283_v58  ;;  %1359 = vmatprep.mubr.f32.mxu0 %v3844_v0  ;;  %v1810_v47 = vrot.slane %v1797_v43, %v1809_v41  ;;  %v1802_v55 = vrot.slane %v1797_v43, %v1801_v50 }
  0xc1   : > { %v1454_v62 = vpop.permute.xlu1 %1453  ;;  %3493 = vmatprep.subr.msk.mxu0 %vm277_vm2, %v1457_v61 }
  0xc2   : > { %v1458_v2 = vsel %vm1455_vm9, %v1452_v60, %v1454_v62 }
  0xc3   : > { %v1281_v63 = vpop.permute.xlu0 %1280 }
  0xc4   : > { %v1285_v3 = vsel %vm1282_vm8, %v1279_v52, %v1281_v63  ;;  %v1805_v52 = vsub.s32 1, %v1800_v37 }
  0xc5   : > { %3627 = vmatpush3.msk.msra.mxu1 %vm277_vm2, %v1285_v3  ;;  %v1625_v6 = vpop.permute.xlu1 %1624 }
  0xc6   : > { %3629 = vmatmul.mubr.msk.f32.vlgmr.msra.gmra.mrb[12].mxu1 %vm273_vm4, %v3486_v1  ;;  %3631 = vmatprep.subr.mxu1 %v3844_v0  ;;  %v1806_v58 = vrot.slane %v1797_v43, %v1805_v52 }
  0xc7   : > { %3489 = vmatmul.mubr.msk.f32.vlgmr.msra.gmra.mrb[0].mxu0 %vm273_vm4, %v3486_v1  ;;  %3632 = vmatpush3.msk.msra.mxu1 %vm277_vm2, %v1458_v2  ;;  %v1623_v9 = vpop.permute.xlu0 %1622 }
  0xc8   : > { %3494 = vmatpush1.msk.msra.mxu0 %vm277_vm2, %v1456_v4  ;;  %3633 = vmatprep.mubr.msk.f32.mxu1 %vm3848_vm0, %v3844_v0  ;;  %v1630_v10 = vsel %vm1628_vm10, %v1623_v9, %v1625_v6 }
  0xc9   : > { %v1627_v11 = vpop.permute.xlu1 %1626  ;;  %3636 = vmatprep.subr.mxu1 %v3844_v0  ;;  %1532 = vmatprep.mubr.f32.mxu0 %v3844_v0 }
  0xca   : > { %3634 = vmatmul.mubr.msk.f32.vlgmr.msra.gmra.mrb[14].mxu1 %vm273_vm4, %v3492_v8  ;;  %v1631_v12 = vsel %vm1628_vm10, %v1625_v6, %v1627_v11  ;;  %3499 = vmatprep.subr.msk.mxu0 %vm277_vm2, %v1630_v10  ;;  %v3346_v10 = vld [vmem:[%s4376_s5] sm:$0xf] }
  0xcb   : > { %3637 = vmatpush3.msk.msra.mxu1 %vm277_vm2, %v1631_v12  ;;  %3638 = vmatprep.mubr.msk.f32.mxu1 %vm3848_vm0, %v3844_v0  ;;  %v1621_v14 = vpop.permute.xlu0 %1620 }
  0xcc   : > { %3641 = vmatprep.subr.mxu1 %v3844_v0  ;;  %v1629_v15 = vsel %vm1628_vm10, %v1621_v14, %v1623_v9 }
  0xce   : > { %3639 = vmatmul.mubr.msk.f32.vlgmr.msra.gmra.mrb[16].mxu1 %vm273_vm4, %v3498_v13 }
  0xcf   : > { %3495 = vmatmul.mubr.msk.f32.vlgmr.msra.gmra.mrb[0].mxu0 %vm273_vm4, %v3492_v8  ;;  %3643 = vmatprep.mubr.msk.f32.mxu1 %vm3848_vm0, %v3844_v0 }
  0xd0   : > { %3500 = vmatpush1.msk.msra.mxu0 %vm277_vm2, %v1629_v15  ;;  %1705 = vmatprep.mubr.f32.mxu0 %v3844_v0 }
  0xd7   : > { %3501 = vmatmul.mubr.msk.f32.vlgmr.msra.gmra.mrb[0].mxu0 %vm273_vm4, %v3498_v13 }
  0xd8   : > { %1916 = vmatprep.mubr.f32.mxu0 %v3844_v0 }
  0xdc   : > { %v1789_v44 = vpop.permute.xlu0 %1788 }
 0x17d   : > { %v421_v16 = vpop.f32.mrb[0].mxu1 }
 0x17e   : > { %v3600_v17 = vpop.f32.mrb[1].mxu1 }
 0x181   : > { %v583_v18 = vpop.f32.mrb[2].mxu1 }
 0x182   : > { %v584_v19 = vadd.f32 %v583_v18, %v421_v16  ;;  %v3605_v20 = vpop.f32.mrb[3].mxu1  ;;  %v3504_v16 = vld [vmem:[%s4375_s4 + $0x4] sm:$0xf] }
 0x185   : > { %v753_v21 = vpop.f32.mrb[4].mxu1 }
 0x186   : > { %v759_v22 = vadd.f32 %v753_v21, %v584_v19  ;;  %v3610_v23 = vpop.f32.mrb[5].mxu1 }
 0x189   : > { %v926_v24 = vpop.f32.mrb[6].mxu1 }
 0x18a   : > { %v932_v25 = vadd.f32 %v926_v24, %v759_v22  ;;  %v3615_v26 = vpop.f32.mrb[7].mxu1  ;;  %v1823_v24 = vld [vmem:[%s4375_s4] sm:$0xf] }
 0x18d   : > { %v1086_v27 = vpop.f32.mrb[8].mxu1 }
 0x18e   : > { %v1092_v28 = vadd.f32 %v1086_v27, %v932_v25  ;;  %v3620_v29 = vpop.f32.mrb[9].mxu1 }
 0x191   : > { %v1259_v30 = vpop.f32.mrb[10].mxu1 }
 0x192   : > { %v1265_v31 = vadd.f32 %v1259_v30, %v1092_v28  ;;  %v3625_v32 = vpop.f32.mrb[11].mxu1 }
 0x193   : > { %v3515_v32 = vld [vmem:[%s4375_s4 + $0x8] sm:$0xf] }
 0x199   : > { %v1432_v34 = vpop.f32.mrb[12].mxu1 }
 0x19a   : > { %v1438_v35 = vadd.f32 %v1432_v34, %v1265_v31  ;;  %v3630_v36 = vpop.f32.mrb[13].mxu1 }
 0x19d   : > { %v1605_v38 = vpop.f32.mrb[14].mxu1 }
 0x19e   : > { %v1611_v39 = vadd.f32 %v1605_v38, %v1438_v35  ;;  %v3635_v40 = vpop.f32.mrb[15].mxu1 }
 0x1a1   : > { %v1778_v42 = vpop.f32.mrb[16].mxu1 }
 0x1a2   : > { %v1784_v45 = vadd.f32 %v1778_v42, %v1611_v39  ;;  %v3640_v46 = vpop.f32.mrb[17].mxu1  ;;  %v3521_v39 = vld [vmem:[%s4375_s4 + $0xc] sm:$0xf] }
 0x1a3   : > { %v3527_v46 = vld [vmem:[%s4375_s4 + $0x10] sm:$0xf] }
 0x1a4   : > { %v1793_v48 = vadd.f32 %v1789_v44, %v1784_v45 }
 0x1a6   : > { %v1796_v49 = vmax.f32 %v1793_v48, 0.0 }
 0x1a8   : > { %v1816_v51 = vmul.f32 %v1810_v47, %v1796_v49 }
 0x1aa   : > { %1822 = vst [vmem:[#allocation2 + $0xc] sm:$0xf] %v1816_v51  ;;  %v1707_v53 = vpop.f32.mrb[0].mxu0 }
 0x1ab   : > { %v1791_v54 = vadd.f32 %v1789_v44, %v1707_v53  ;;  %v1709_v56 = vpop.f32.mrb[1].mxu0 }
 0x1ac   : > { %v1792_v57 = vadd.f32 %v1789_v44, %v1709_v56 }
 0x1ad   : > { %v1794_v59 = vmax.f32 %v1791_v54, 0.0 }
 0x1ae   : > { %v1795_v60 = vmax.f32 %v1792_v57, 0.0 }
 0x1af   : > { %v1814_v61 = vmul.f32 %v1802_v55, %v1794_v59  ;;  %v3533_v55 = vld [vmem:[%s4375_s4 + $0x14] sm:$0xf] }
 0x1b0   : > { %v1815_v62 = vmul.f32 %v1806_v58, %v1795_v60 }
 0x1b1   : > { %v2661_v8 = vld [vmem:[#allocation2 + $0xc] sm:$0xff] }
 0x1b2   : > { %v4143_v63 = vcombine.low %v1814_v61, %v1815_v62  ;;  %v4160_v6 = vcombine.low %v1815_v62, %v1815_v62  ;;  %v2665_v9 = vcombine.high %v2661_v8, %v2661_v8  ;;  %v2501_v56 = vld [vmem:[#allocation2 + $0xc] sm:$0xf] }
 0x1b4   : > { %1821 = vst [vmem:[#allocation2 + $0x4] sm:$0xff] %v4143_v63 }
 0x1bb   : > { %v1824_v1 = vld [vmem:[#allocation2] sm:$0xff]  ;;  %v1825_v3 = vld [vmem:[#allocation2 + $0x8] sm:$0xff] }
 0x1bc   : > { %1832 = vrot.lane.b32.xlu0 %v1824_v1, %s3845_s14  ;;  %v1830_v2 = vcombine.high %v1824_v1, %v1824_v1  ;;  %v2333_v4 = vcombine.high %v1825_v3, %v1825_v3 }
 0x1be   : > { %1834 = vrot.lane.b32.xlu1 %v1830_v2, %s3845_s14 }
 0x1c0   : > { %1997 = vrot.lane.b32.xlu0 %v1825_v3, %s3846_s15 }
 0x1c2   : > { %1836 = vrot.lane.b32.xlu1 %v1825_v3, %s3845_s14 }
 0x1c4   : > { %2164 = vrot.lane.b32.xlu0 %v1830_v2, %s3847_s16 }
 0x1c6   : > { %1995 = vrot.lane.b32.xlu1 %v1830_v2, %s3846_s15 }
 0x1c8   : > { %2162 = vrot.lane.b32.xlu0 %v1824_v1, %s3847_s16 }
 0x1ca   : > { %1993 = vrot.lane.b32.xlu1 %v1824_v1, %s3846_s15 }
 0x1cc   : > { %2338 = vrot.lane.b32.xlu0 %v1825_v3, %s3849_s17 }
 0x1ce   : > { %2166 = vrot.lane.b32.xlu1 %v1825_v3, %s3847_s16 }
 0x1d0   : > { %2666 = vrot.lane.b32.xlu0 %v4143_v63, %s3850_s18 }
 0x1d2   : > { %2336 = vrot.lane.b32.xlu1 %v1830_v2, %s3849_s17 }
 0x1d4   : > { %1838 = vrot.lane.b32.xlu0 %v2333_v4, %s3845_s14 }
 0x1d6   : > { %2334 = vrot.lane.b32.xlu1 %v1824_v1, %s3849_s17 }
 0x1d8   : > { %2668 = vrot.lane.b32.xlu0 %v4160_v6, %s3850_s18 }
 0x1da   : > { %2670 = vrot.lane.b32.xlu1 %v2661_v8, %s3850_s18 }
 0x1dc   : > { %2842 = vrot.lane.b32.xlu0 %v2661_v8, %s3851_s19 }
 0x1de   : > { %1999 = vrot.lane.b32.xlu1 %v2333_v4, %s3846_s15  ;;  %s3784_s15 = sshll.u32 %s3855_s25, 4  ;;  %s3785_s15 = int_to_ptr.vmem [resolvable:$false] %s3784_s15 }
 0x1e0   : > { %2340 = vrot.lane.b32.xlu0 %v2333_v4, %s3849_s17 }
 0x1e2   : > { %2838 = vrot.lane.b32.xlu1 %v4143_v63, %s3851_s19 }
 0x1e4   : > { %2672 = vrot.lane.b32.xlu0 %v2665_v9, %s3850_s18 }
 0x1e6   : > { %2168 = vrot.lane.b32.xlu1 %v2333_v4, %s3847_s16  ;;  %s3786_s16 = scalar_lea.vmem %s3785_s15, 384 }
 0x1e8   : > { %3014 = vrot.lane.b32.xlu0 %v2661_v8, %s3852_s20 }
 0x1ea   : > { %2840 = vrot.lane.b32.xlu1 %v4160_v6, %s3851_s19 }
 0x1ec   : > { %2844 = vrot.lane.b32.xlu0 %v2665_v9, %s3851_s19 }
 0x1ee   : > { %3010 = vrot.lane.b32.xlu1 %v4143_v63, %s3852_s20 }
 0x1f0   : > { %3184 = vrot.lane.b32.xlu0 %v4160_v6, %s3853_s26 }
 0x1f2   : > { %3012 = vrot.lane.b32.xlu1 %v4160_v6, %s3852_s20 }
 0x1f4   : > { %3182 = vrot.lane.b32.xlu0 %v4143_v63, %s3853_s26 }
 0x1f6   : > { %3016 = vrot.lane.b32.xlu1 %v2665_v9, %s3852_s20  ;;  %s242_s20 = sand.u32 1, %s3834_s22  }
 0x1f7   : > { %s3373_s10 = scalar_lea.sflag [#allocation4], %s242_s20 }
 0x1f8   : > { %3349 = vperm.xlu0 %3771, %v3346_v10  }
 0x1fa   : > { %3186 = vrot.lane.b32.xlu1 %v2661_v8, %s3853_s26 }
 0x1fe   : > { %3188 = vrot.lane.b32.xlu1 %v2665_v9, %s3853_s26  ;;  %v3545_v9 = vld [vmem:[%s4375_s4 + $0x1c] sm:$0xf]  ;;  %s3718_s26 = smul.u32 12, %s242_s20 }
 0x200   : > { %s244_s11 = scalar_lea.vmem [#allocation3], %s3718_s26 }
 0x201   : > { %s3387_s28 = sshll.u32 %s244_s11, 4  ;;  %s4331_s28 = int_to_ptr.vmem [resolvable:$true] %s3387_s28 }
 0x202   : > { %s3780_s14 = scalar_lea.vmem %s4331_s28, 192  ;;  %p3787_p0 = scmp.lt.s32.totalorder %s4331_s28, %s3785_s15 }
 0x203   : > { %p3781_p11 = scmp.ne.s32.totalorder %s4331_s28, %s3780_s14  ;;  %p3788_p1 = scmp.lt.s32.totalorder %s3786_s16, %s3780_s14 }
 0x205   : > { %p3782_p12 = pnand %p3781_p11, %p3929_p5  ;;  %p3789_p2 = por %p3788_p1, %p3787_p0 }
 0x207   : > { %p3783_p13 = pneg %p3782_p12 }
 0x209   : > { %p3790_p3 = pnand %p3789_p2, %p3783_p13 }
 0x22e   : > { %v1833_v11 = vpop.permute.xlu0 %1832 }
 0x230   : > { %v1835_v12 = vpop.permute.xlu1 %1834 }
 0x231   : > { %v1840_v17 = vsel %vm269_vm1, %v1833_v11, %v1835_v12 }
 0x232   : > { %v1998_v13 = vpop.permute.xlu0 %1997 }
 0x234   : > { %v1837_v14 = vpop.permute.xlu1 %1836 }
 0x235   : > { %v1841_v15 = vsel %vm269_vm1, %v1835_v12, %v1837_v14 }
 0x236   : > { %v2165_v18 = vpop.permute.xlu0 %2164  ;;  %3505 = vmatprep.subr.msk.mxu0 %vm277_vm2, %v1841_v15 }
 0x237   : > { %3506 = vmatpush1.msk.msra.mxu0 %vm277_vm2, %v1840_v17 }
 0x238   : > { %3507 = vmatmul.mubr.msk.f32.vlgmr.msra.gmra.mrb[2].mxu0 %vm273_vm4, %v3504_v16  ;;  %v1996_v19 = vpop.permute.xlu1 %1995 }
 0x239   : > { %v2002_v20 = vsel %vm433_vm3, %v1996_v19, %v1998_v13  ;;  %2077 = vmatprep.mubr.f32.mxu0 %v3844_v0 }
 0x23a   : > { %v2163_v21 = vpop.permute.xlu0 %2162  ;;  %3510 = vmatprep.subr.msk.mxu0 %vm277_vm2, %v2002_v20 }
 0x23b   : > { %v2170_v28 = vsel %vm603_vm5, %v2163_v21, %v2165_v18 }
 0x23c   : > { %v1994_v22 = vpop.permute.xlu1 %1993 }
 0x23d   : > { %v2001_v23 = vsel %vm433_vm3, %v1994_v22, %v1996_v19 }
 0x23e   : > { %v2339_v25 = vpop.permute.xlu0 %2338  ;;  %3511 = vmatpush1.msk.msra.mxu0 %vm277_vm2, %v2001_v23 }
 0x240   : > { %3512 = vmatmul.mubr.msk.f32.vlgmr.msra.gmra.mrb[2].mxu0 %vm273_vm4, %v1823_v24  ;;  %v2167_v26 = vpop.permute.xlu1 %2166 }
 0x241   : > { %v2171_v27 = vsel %vm603_vm5, %v2165_v18, %v2167_v26  ;;  %2246 = vmatprep.mubr.f32.mxu0 %v3844_v0 }
 0x242   : > { %v2667_v29 = vpop.permute.xlu0 %2666  ;;  %3516 = vmatprep.subr.msk.mxu0 %vm277_vm2, %v2171_v27 }
 0x243   : > { %3517 = vmatpush1.msk.msra.mxu0 %vm277_vm2, %v2170_v28 }
 0x244   : > { %v2337_v30 = vpop.permute.xlu1 %2336 }
 0x245   : > { %v2343_v31 = vsel %vm776_vm6, %v2337_v30, %v2339_v25 }
 0x246   : > { %v1839_v33 = vpop.permute.xlu0 %1838  ;;  %3522 = vmatprep.subr.msk.mxu0 %vm277_vm2, %v2343_v31 }
 0x247   : > { %v1842_v34 = vsel %vm269_vm1, %v1837_v14, %v1839_v33  ;;  %v3551_v14 = vld [vmem:[%s4375_s4 + $0x20] sm:$0xf] }
 0x248   : > { %3642 = vmatpush3.msk.msra.mxu1 %vm277_vm2, %v1842_v34  ;;  %3518 = vmatmul.mubr.msk.f32.vlgmr.msra.gmra.mrb[2].mxu0 %vm273_vm4, %v3515_v32  ;;  %v2335_v35 = vpop.permute.xlu1 %2334 }
 0x249   : > { %v2342_v36 = vsel %vm776_vm6, %v2335_v35, %v2337_v30  ;;  %2418 = vmatprep.mubr.f32.mxu0 %v3844_v0  ;;  %3646 = vmatprep.subr.mxu1 %v3844_v0 }
 0x24a   : > { %v2669_v37 = vpop.permute.xlu0 %2668  ;;  %3523 = vmatpush1.msk.msra.mxu0 %vm277_vm2, %v2342_v36  ;;  %3644 = vmatmul.mubr.msk.f32.vlgmr.msra.gmra.mrb[18].mxu1 %vm273_vm4, %v3504_v16 }
 0x24b   : > { %3528 = vmatprep.subr.msk.mxu0 %vm277_vm2, %v4160_v6  ;;  %3648 = vmatprep.mubr.msk.f32.mxu1 %vm3848_vm0, %v3844_v0  ;;  %v2674_v48 = vsel %vm1109_vm7, %v2667_v29, %v2669_v37 }
 0x24c   : > { %v2671_v38 = vpop.permute.xlu1 %2670 }
 0x24d   : > { %v2675_v42 = vsel %vm1109_vm7, %v2669_v37, %v2671_v38 }
 0x24e   : > { %v2843_v40 = vpop.permute.xlu0 %2842 }
 0x250   : > { %3524 = vmatmul.mubr.msk.f32.vlgmr.msra.gmra.mrb[2].mxu0 %vm273_vm4, %v3521_v39  ;;  %v2000_v41 = vpop.permute.xlu1 %1999 }
 0x251   : > { %3529 = vmatpush1.msk.msra.mxu0 %vm277_vm2, %v4143_v63  ;;  %v2003_v43 = vsel %vm433_vm3, %v1998_v13, %v2000_v41  ;;  %2578 = vmatprep.mubr.f32.mxu0 %v3844_v0  ;;  %v3539_v63 = vld [vmem:[%s4375_s4 + $0x18] sm:$0xf] }
 0x252   : > { %3534 = vmatprep.subr.msk.mxu0 %vm277_vm2, %v2675_v42  ;;  %v2341_v44 = vpop.permute.xlu0 %2340  ;;  %3647 = vmatpush3.msk.msra.mxu1 %vm277_vm2, %v2003_v43  ;;  %v3356_v42 = vld [vmem:[%s3948_s13 + $0xc] sm:$0xf] }
 0x253   : > { %3649 = vmatmul.mubr.msk.f32.vlgmr.msra.gmra.mrb[20].mxu1 %vm273_vm4, %v1823_v24  ;;  %3651 = vmatprep.subr.mxu1 %v3844_v0  ;;  %v2344_v51 = vsel %vm776_vm6, %v2339_v25, %v2341_v44 }
 0x254   : > { %v2839_v45 = vpop.permute.xlu1 %2838  ;;  %3653 = vmatprep.mubr.msk.f32.mxu1 %vm3848_vm0, %v3844_v0 }
 0x256   : > { %v2673_v47 = vpop.permute.xlu0 %2672 }
 0x257   : > { %v2676_v60 = vsel %vm1109_vm7, %v2671_v38, %v2673_v47 }
 0x258   : > { %3530 = vmatmul.mubr.msk.f32.vlgmr.msra.gmra.mrb[2].mxu0 %vm273_vm4, %v3527_v46  ;;  %v2169_v49 = vpop.permute.xlu1 %2168 }
 0x259   : > { %3535 = vmatpush1.msk.msra.mxu0 %vm277_vm2, %v2674_v48  ;;  %v2172_v50 = vsel %vm603_vm5, %v2167_v26, %v2169_v49  ;;  %2750 = vmatprep.mubr.f32.mxu0 %v3844_v0 }
 0x25a   : > { %3652 = vmatpush3.msk.msra.mxu1 %vm277_vm2, %v2172_v50  ;;  %v3015_v52 = vpop.permute.xlu0 %3014 }
 0x25b   : > { %3654 = vmatmul.mubr.msk.f32.vlgmr.msra.gmra.mrb[22].mxu1 %vm273_vm4, %v3515_v32  ;;  %3656 = vmatprep.subr.mxu1 %v3844_v0 }
 0x25c   : > { %3657 = vmatpush3.msk.msra.mxu1 %vm277_vm2, %v2344_v51  ;;  %v2841_v53 = vpop.permute.xlu1 %2840  ;;  %3658 = vmatprep.mubr.msk.f32.mxu1 %vm3848_vm0, %v3844_v0 }
 0x25d   : > { %v2847_v54 = vsel %vm1282_vm8, %v2841_v53, %v2843_v40  ;;  %3661 = vmatprep.subr.mxu1 %v3844_v0  ;;  %v2846_v57 = vsel %vm1282_vm8, %v2839_v45, %v2841_v53 }
 0x25e   : > { %3540 = vmatprep.subr.msk.mxu0 %vm277_vm2, %v2847_v54  ;;  %v2845_v59 = vpop.permute.xlu0 %2844 }
 0x25f   : > { %3659 = vmatmul.mubr.msk.f32.vlgmr.msra.gmra.mrb[24].mxu1 %vm273_vm4, %v3521_v39  ;;  %v2848_v1 = vsel %vm1282_vm8, %v2843_v40, %v2845_v59 }
 0x260   : > { %3662 = vmatpush3.msk.msra.mxu1 %vm277_vm2, %v2501_v56  ;;  %3536 = vmatmul.mubr.msk.f32.vlgmr.msra.gmra.mrb[2].mxu0 %vm273_vm4, %v3533_v55  ;;  %v3011_v58 = vpop.permute.xlu1 %3010 }
 0x261   : > { %3541 = vmatpush1.msk.msra.mxu0 %vm277_vm2, %v2846_v57  ;;  %3663 = vmatprep.mubr.msk.f32.mxu1 %vm3848_vm0, %v3844_v0 }
 0x262   : > { %3666 = vmatprep.subr.mxu1 %v3844_v0  ;;  %2922 = vmatprep.mubr.f32.mxu0 %v3844_v0  ;;  %v3185_v2 = vpop.permute.xlu0 %3184 }
 0x263   : > { %3664 = vmatmul.mubr.msk.f32.vlgmr.msra.gmra.mrb[26].mxu1 %vm273_vm4, %v3527_v46 }
 0x264   : > { %3667 = vmatpush3.msk.msra.mxu1 %vm277_vm2, %v2676_v60  ;;  %v3013_v61 = vpop.permute.xlu1 %3012  ;;  %3668 = vmatprep.mubr.msk.f32.mxu1 %vm3848_vm0, %v3844_v0 }
 0x265   : > { %v3019_v62 = vsel %vm1455_vm9, %v3013_v61, %v3015_v52  ;;  %3671 = vmatprep.subr.mxu1 %v3844_v0  ;;  %v3018_v3 = vsel %vm1455_vm9, %v3011_v58, %v3013_v61 }
 0x266   : > { %3546 = vmatprep.subr.msk.mxu0 %vm277_vm2, %v3019_v62  ;;  %v3183_v10 = vpop.permute.xlu0 %3182 }
 0x267   : > { %3669 = vmatmul.mubr.msk.f32.vlgmr.msra.gmra.mrb[28].mxu1 %vm273_vm4, %v3533_v55  ;;  %v3190_v12 = vsel %vm1628_vm10, %v3183_v10, %v3185_v2 }
 0x268   : > { %3672 = vmatpush3.msk.msra.mxu1 %vm277_vm2, %v2848_v1  ;;  %3542 = vmatmul.mubr.msk.f32.vlgmr.msra.gmra.mrb[2].mxu0 %vm273_vm4, %v3539_v63  ;;  %v3017_v4 = vpop.permute.xlu1 %3016 }
 0x269   : > { %3547 = vmatpush1.msk.msra.mxu0 %vm277_vm2, %v3018_v3  ;;  %v3020_v6 = vsel %vm1455_vm9, %v3015_v52, %v3017_v4  ;;  %3673 = vmatprep.mubr.msk.f32.mxu1 %vm3848_vm0, %v3844_v0 }
 0x26a   : > { %3676 = vmatprep.subr.mxu1 %v3844_v0  ;;  %3094 = vmatprep.mubr.f32.mxu0 %v3844_v0 }
 0x26b   : > { %3674 = vmatmul.mubr.msk.f32.vlgmr.msra.gmra.mrb[30].mxu1 %vm273_vm4, %v3539_v63 }
 0x26c   : > { %3677 = vmatpush3.msk.msra.mxu1 %vm277_vm2, %v3020_v6  ;;  %v3187_v8 = vpop.permute.xlu1 %3186  ;;  %3678 = vmatprep.mubr.msk.f32.mxu1 %vm3848_vm0, %v3844_v0 }
 0x26d   : > { %v3191_v11 = vsel %vm1628_vm10, %v3185_v2, %v3187_v8  ;;  %3681 = vmatprep.subr.mxu1 %v3844_v0 }
 0x26e   : > { %3552 = vmatprep.subr.msk.mxu0 %vm277_vm2, %v3191_v11 }
 0x26f   : > { %3679 = vmatmul.mubr.msk.f32.vlgmr.msra.gmra.mrb[32].mxu1 %vm273_vm4, %v3545_v9 }
 0x270   : > { %3548 = vmatmul.mubr.msk.f32.vlgmr.msra.gmra.mrb[2].mxu0 %vm273_vm4, %v3545_v9  ;;  %v3189_v13 = vpop.permute.xlu1 %3188  ;;  %3683 = vmatprep.mubr.msk.f32.mxu1 %vm3848_vm0, %v3844_v0 }
 0x271   : > { %3553 = vmatpush1.msk.msra.mxu0 %vm277_vm2, %v3190_v12  ;;  %v3192_v15 = vsel %vm1628_vm10, %v3187_v8, %v3189_v13  ;;  %3266 = vmatprep.mubr.f32.mxu0 %v3844_v0 }
 0x272   : > { %3682 = vmatpush3.msk.msra.mxu1 %vm277_vm2, %v3192_v15 }
 0x273   : > { %3684 = vmatmul.mubr.msk.f32.vlgmr.msra.gmra.mrb[34].mxu1 %vm273_vm4, %v3551_v14 }
 0x277   : > { %v3350_v41 = vpop.permute.xlu0 %3349 }
 0x278   : > { %3554 = vmatmul.mubr.msk.f32.vlgmr.msra.gmra.mrb[2].mxu0 %vm273_vm4, %v3551_v14 }
 0x31d   : > { %v1989_v16 = vpop.f32.mrb[18].mxu1 }
 0x31e   : > { %v3645_v17 = vpop.f32.mrb[19].mxu1 }
 0x326   : > { %v2150_v18 = vpop.f32.mrb[20].mxu1 }
 0x327   : > { %v2151_v19 = vadd.f32 %v2150_v18, %v1989_v16  ;;  %v3650_v20 = vpop.f32.mrb[21].mxu1 }
 0x32e   : > { %v2319_v21 = vpop.f32.mrb[22].mxu1 }
 0x32f   : > { %v2325_v22 = vadd.f32 %v2319_v21, %v2151_v19  ;;  %v3655_v23 = vpop.f32.mrb[23].mxu1 }
 0x332   : > { %v2491_v24 = vpop.f32.mrb[24].mxu1 }
 0x333   : > { %v2497_v25 = vadd.f32 %v2491_v24, %v2325_v22  ;;  %v3660_v26 = vpop.f32.mrb[25].mxu1 }
 0x336   : > { %v2651_v27 = vpop.f32.mrb[26].mxu1 }
 0x337   : > { %v2657_v0 = vadd.f32 %v2651_v27, %v2497_v25  ;;  %v3665_v28 = vpop.f32.mrb[27].mxu1 }
 0x33a   : > { %v2823_v29 = vpop.f32.mrb[28].mxu1 }
 0x33b   : > { %v2829_v30 = vadd.f32 %v2823_v29, %v2657_v0  ;;  %v3670_v31 = vpop.f32.mrb[29].mxu1 }
 0x33e   : > { %v2995_v32 = vpop.f32.mrb[30].mxu1 }
 0x33f   : > { %v3001_v33 = vadd.f32 %v2995_v32, %v2829_v30  ;;  %v3675_v34 = vpop.f32.mrb[31].mxu1 }
 0x342   : > { %v3167_v35 = vpop.f32.mrb[32].mxu1 }
 0x343   : > { %v3173_v36 = vadd.f32 %v3167_v35, %v3001_v33  ;;  %v3680_v37 = vpop.f32.mrb[33].mxu1 }
 0x346   : > { %v3339_v38 = vpop.f32.mrb[34].mxu1 }
 0x347   : > { %v3345_v39 = vadd.f32 %v3339_v38, %v3173_v36  ;;  %v3685_v40 = vpop.f32.mrb[35].mxu1 }
 0x349   : > { %v3354_v43 = vadd.f32 %v3350_v41, %v3345_v39 }
 0x34b   : > { %v3362_v44 = vadd.f32 %v3356_v42, %v3354_v43  ;;  %v3268_v45 = vpop.f32.mrb[2].mxu0 }
 0x34c   : > { %v3352_v46 = vadd.f32 %v3350_v41, %v3268_v45  ;;  %v3270_v47 = vpop.f32.mrb[3].mxu0 }
 0x34d   : > { %v3365_v48 = vmax.f32 %v3362_v44, 0.0  ;;  %v3353_v49 = vadd.f32 %v3350_v41, %v3270_v47 }
 0x34e   : > { %v3360_v50 = vadd.f32 %v3352_v46, %v3967_v5 }
 0x34f   : > { %v3361_v51 = vadd.f32 %v3353_v49, %v3974_v7  ;;  %3371 = vst [vmem:[%s244_s11 + $0x8] sm:$0xf] %v3365_v48 }
 0x350   : > { %v3363_v52 = vmax.f32 %v3360_v50, 0.0 }
 0x351   : > { %v3364_v53 = vmax.f32 %v3361_v51, 0.0 }
 0x353   : > { %v3368_v54 = vcombine.low %v3363_v52, %v3364_v53 }
 0x355   : > { %3370 = vst [vmem:[%s244_s11] sm:$0xff] %v3368_v54 }
 0x356   : > { %3793 = shalt.err (!%p3790_p3)
}
 0x357   : > { %s3794_s17 = scalar_lea.hbm %s4329_s9, 192  ;;  %s3798_s20 = scalar_lea.hbm %s4377_s6, 384 }
 0x358   : > { %p3795_p4 = scmp.ne.s32.totalorder %s4329_s9, %s3794_s17  ;;  %p3799_p9 = scmp.lt.u32.totalorder %s4329_s9, %s4377_s6 }
 0x359   : > { %p3800_p10 = scmp.lt.u32.totalorder %s3798_s20, %s3794_s17  ;;  %p3802_p12 = scmp.lt.u32.totalorder %s3794_s17, %s4329_s9 }
 0x35a   : > { %p3796_p7 = pnand %p3795_p4, %p3929_p5 }
 0x35b   : > { %p3801_p11 = por %p3800_p10, %p3799_p9 }
 0x35c   : > { %p3797_p8 = pneg %p3796_p7 }
 0x35d   : > { %p3803_p13 = por %p3802_p12, %p3801_p11 }
 0x35f   : > { %p3804_p0 = pnand %p3803_p13, %p3797_p8 }
 0x361   : > { %3807 = shalt.err (!%p3804_p0)
}
 0x362   : > { %3721 = dma.vmem_to_hbm [thread:$0]  (%p3929_p5), %s4331_s28, 192, %s4329_s9, %s3373_s10  }
 0x363 PF: > { %p3727_p1 = scmp.ge.s32.totalorder %s3842_s24, 2  ;;  %s3399_s12 = sand.u32 1, %s3830_s21  }
 0x364   : > { %s3400_s13 = scalar_lea.sflag [#allocation4], %s3399_s12 }
 0x365   : > { %p3724_p2 = pnand %p3727_p1, %p3933_p6 }
 0x367   : > { %3825 = dma.done.wait (!%p3724_p2), %s3400_s13, 192  }
 0x368   : > { %3827 = vsyncadd (!%p3724_p2), %s3400_s13, 4294967104  ;;  %p16_p3 = scmp.ge.s32.totalorder %s3916_s27, 4   ;;  %s4380_s21 = smov %s3834_s22 }
 0x369   : > { %s4381_s22 = smov %s3838_s23  ;;  %s4382_s23 = smov %s3927_s30 }
 0x36a   : > { %s4383_s24 = smov %s3916_s27  ;;  %18 = sbr.rel (!%p16_p3) target bundleno = 3 (0x3), region = 95 }
 0x371   :  { %3405 = vsyncpa [#allocation4], 1 }
 0x372   :  { %3407 = vsyncpa [#allocation4 + $0x1], 1 }

</bundles_post_ra>
